<compile_context>
chip_gen: v7x
topology: tpu7x:2x2x1
jax: 0.10.0
libtpu: 0.0.40
codegen_flags: <defaults>
</compile_context>

<pallas_src>
import functools

import jax
import jax.numpy as jnp
from jax.experimental import pallas as pl
from jax.experimental.pallas import tpu as pltpu


def _round_up(x, m):
    return ((x + m - 1) // m) * m


# ---------------------------------------------------------------------------
# Kernels: one (row-tile, hidden-chunk) step of relu(x@W1 + b1) @ W2 + b2.
# ReLU is per hidden column, so chunked accumulation over the hidden axis is
# mathematically identical to the unchunked FFN.
# ---------------------------------------------------------------------------
def ffn_kernel_acc_out(x_ref, w1_ref, b1_ref, w2_ref, b2_ref, o_ref):
    """f32 output: accumulate directly into o_ref (no scratch)."""
    k = pl.program_id(1)

    @pl.when(k == 0)
    def _():
        o_ref[...] = jnp.broadcast_to(b2_ref[...], o_ref.shape).astype(o_ref.dtype)

    h = jnp.dot(x_ref[...].astype(w1_ref.dtype), w1_ref[...],
                preferred_element_type=jnp.float32)
    h = jnp.maximum(h + b1_ref[...], 0.0)          # (tm, th) f32, chunk-bounded
    o_ref[...] += jnp.dot(h.astype(w2_ref.dtype), w2_ref[...],
                          preferred_element_type=jnp.float32)


def ffn_kernel_scratch(x_ref, w1_ref, b1_ref, w2_ref, b2_ref, o_ref, acc_ref):
    """Non-f32 output: accumulate in an f32 VMEM scratch, cast at the end."""
    k = pl.program_id(1)

    @pl.when(k == 0)
    def _():
        acc_ref[...] = jnp.broadcast_to(b2_ref[...], acc_ref.shape)

    h = jnp.dot(x_ref[...].astype(w1_ref.dtype), w1_ref[...],
                preferred_element_type=jnp.float32)
    h = jnp.maximum(h + b1_ref[...], 0.0)
    acc_ref[...] += jnp.dot(h.astype(w2_ref.dtype), w2_ref[...],
                            preferred_element_type=jnp.float32)

    @pl.when(k == pl.num_programs(1) - 1)
    def _():
        o_ref[...] = acc_ref[...].astype(o_ref.dtype)


# ---------------------------------------------------------------------------
# VMEM budgeting (generation-aware: 128 MiB on v5e/v6e, 64 MiB per TC on v7x)
# ---------------------------------------------------------------------------
def _vmem_budget_bytes():
    try:
        cap = int(pltpu.get_tpu_info().vmem_capacity_bytes)
    except Exception:
        cap = 64 * 1024 * 1024          # conservative fallback (v7x per-core)
    return int(cap * 0.78)              # ~100 MiB on 128 MiB parts, ~50 MiB on v7x


def _vmem_need(tm, th, c_pad, x_bytes, out_bytes, use_scratch, wbuf):
    return (2 * tm * c_pad * x_bytes                  # x tile (double-buffered)
            + wbuf * c_pad * th * 2                   # W1 chunk (bf16)
            + wbuf * th * c_pad * 2                   # W2 chunk (bf16)
            + wbuf * th * 4 + 2 * c_pad * 4           # bias chunks (f32)
            + (tm * c_pad * 4 if use_scratch else 0)  # f32 accumulator
            + 2 * tm * c_pad * out_bytes)             # output tile (double-buffered)


# ---------------------------------------------------------------------------
# One-time weight packing (keep f32->bf16 conversion + padding off the hot path)
# ---------------------------------------------------------------------------
def prepare_params(w1, b1, w2, b2, *, th=1024, tm_hint=512, weight_buffers=2):
    C, H = w1.shape
    c_pad = _round_up(C, 128)
    budget = _vmem_budget_bytes() - (2 << 20)   # headroom for compiler scratch

    # Hidden chunk: largest 128-multiple divisor of round_up(H,128) that is
    # <= th and fits VMEM alongside a tm_hint row tile (no padded hidden cols).
    h128 = _round_up(H, 128)
    cands = sorted(c for c in range(128, min(th, h128) + 1, 128) if h128 % c == 0)
    if not cands:
        cands = [min(_round_up(th, 128), h128)]
    th_eff = cands[0]
    for c in reversed(cands):
        if _vmem_need(tm_hint, c, c_pad, 4, 4, False, weight_buffers) <= budget:
            th_eff = c
            break
    h_pad = _round_up(H, th_eff)

    w1p = jnp.pad(w1, ((0, c_pad - C), (0, h_pad - H))).astype(jnp.bfloat16)
    w2p = jnp.pad(w2, ((0, h_pad - H), (0, c_pad - C))).astype(jnp.bfloat16)
    b1p = jnp.pad(b1, (0, h_pad - H)).reshape(1, h_pad).astype(jnp.float32)
    b2p = jnp.pad(b2, (0, c_pad - C)).reshape(1, c_pad).astype(jnp.float32)

    meta = dict(C=C, th=th_eff, weight_buffers=weight_buffers)
    return (w1p, b1p, w2p, b2p), meta


# ---------------------------------------------------------------------------
# Hot path
# ---------------------------------------------------------------------------
@functools.partial(jax.jit, static_argnames=("C", "th", "tm", "weight_buffers"))
def _ffn_padded(x, w1p, b1p, w2p, b2p, *, C, th, tm, weight_buffers):
    B, T, _ = x.shape
    M = B * T
    c_pad, h_pad = w1p.shape
    out_dtype = x.dtype
    x_bytes = jnp.dtype(x.dtype).itemsize
    out_bytes = jnp.dtype(out_dtype).itemsize
    acc_in_out = (out_dtype == jnp.float32)

    # Row tile: as large as VMEM allows (amortizes weight re-streaming and the
    # ~0.35us/step grid overhead), multiple of 16 (bf16 sublane pairs), and
    # capped so >=2 row tiles exist when M permits (both v7x TCs stay busy).
    budget = _vmem_budget_bytes() - (2 << 20)
    m16 = _round_up(M, 16)
    tm_eff = min(_round_up(tm, 16), m16)
    if m16 >= 32:
        tm_eff = min(tm_eff, _round_up((m16 + 1) // 2, 16))
    while (tm_eff > 128 and
           _vmem_need(tm_eff, th, c_pad, x_bytes, out_bytes,
                      not acc_in_out, weight_buffers) > budget):
        tm_eff = _round_up(tm_eff // 2, 16)
    tm_eff = max(tm_eff, 16)
    m_pad = _round_up(M, tm_eff)

    x2 = x.reshape(M, C)
    if (m_pad, c_pad) != (M, C):
        x2 = jnp.pad(x2, ((0, m_pad - M), (0, c_pad - C)))

    grid = (m_pad // tm_eff, h_pad // th)

    w_kwargs = {}
    if weight_buffers != 2:          # deepen weight-stream pipelining on demand
        w_kwargs = dict(pipeline_mode=pl.Buffered(weight_buffers))

    in_specs = [
        pl.BlockSpec((tm_eff, c_pad), lambda i, k: (i, 0)),            # x rows
        pl.BlockSpec((c_pad, th), lambda i, k: (0, k), **w_kwargs),    # W1 chunk
        pl.BlockSpec((1, th), lambda i, k: (0, k)),                    # b1 chunk
        pl.BlockSpec((th, c_pad), lambda i, k: (k, 0), **w_kwargs),    # W2 chunk
        pl.BlockSpec((1, c_pad), lambda i, k: (0, 0)),                 # b2
    ]

    if acc_in_out:
        kernel = ffn_kernel_acc_out
        scratch = []
    else:
        kernel = ffn_kernel_scratch
        scratch = [pltpu.VMEM((tm_eff, c_pad), jnp.float32)]

    flops = 4 * m_pad * c_pad * h_pad
    bytes_accessed = (m_pad * c_pad * x_bytes
                      + (m_pad // tm_eff) * (w1p.size + w2p.size) * 2
                      + b1p.size * 4 + b2p.size * 4
                      + m_pad * c_pad * out_bytes)

    out = pl.pallas_call(
        kernel,
        out_shape=jax.ShapeDtypeStruct((m_pad, c_pad), out_dtype),
        grid_spec=pltpu.PrefetchScalarGridSpec(
            num_scalar_prefetch=0,
            grid=grid,
            in_specs=in_specs,
            out_specs=pl.BlockSpec((tm_eff, c_pad), lambda i, k: (i, 0)),
            scratch_shapes=scratch,
        ),
        compiler_params=pltpu.CompilerParams(
            dimension_semantics=("parallel", "arbitrary"),
            vmem_limit_bytes=_vmem_budget_bytes(),
        ),
        cost_estimate=pl.CostEstimate(flops=flops, transcendentals=0,
                                      bytes_accessed=bytes_accessed),
    )(x2, w1p, b1p, w2p, b2p)

    return out[:M, :C].reshape(B, T, C)


def feedforward(x, packed, meta, *, tm=512):
    """x: (B, T, C).  `packed`/`meta` come from prepare_params (weights are
    pre-padded and pre-cast to bf16, so the per-call path only streams them)."""
    w1p, b1p, w2p, b2p = packed
    return _ffn_padded(x, w1p, b1p, w2p, b2p, C=meta["C"], th=meta["th"],
                       tm=tm, weight_buffers=meta["weight_buffers"])


def init_params(key, n_embd):
    """Deterministic init mirroring nn.Linear default (U[-1/sqrt(in), 1/sqrt(in)])."""
    hidden = 4 * n_embd
    k1, k2, k3, k4 = jax.random.split(key, 4)
    bound1 = 1.0 / jnp.sqrt(n_embd)
    bound2 = 1.0 / jnp.sqrt(hidden)
    w1 = jax.random.uniform(k1, (n_embd, hidden), jnp.float32, -bound1, bound1)
    b1 = jax.random.uniform(k2, (hidden,), jnp.float32, -bound1, bound1)
    w2 = jax.random.uniform(k3, (hidden, n_embd), jnp.float32, -bound2, bound2)
    b2 = jax.random.uniform(k4, (n_embd,), jnp.float32, -bound2, bound2)
    return w1, b1, w2, b2


if __name__ == "__main__":
    key = jax.random.PRNGKey(0)
    k_x, k_p = jax.random.split(key)

    B, T, n_embd = 2, 8, 32           # small shapes consistent with the module
    dropout = 0.1                      # inference mode -> identity

    x = jax.random.normal(k_x, (B, T, n_embd), jnp.float32)
    w1, b1, w2, b2 = init_params(k_p, n_embd)

    packed, meta = prepare_params(w1, b1, w2, b2)   # one-time weight packing
    out = feedforward(x, packed, meta)
    out = jax.block_until_ready(out)

    # Reference mirroring the kernel's bf16-MXU / f32-accumulate numerics.
    xb = x.reshape(B * T, n_embd).astype(jnp.bfloat16).astype(jnp.float32)
    w1b = w1.astype(jnp.bfloat16).astype(jnp.float32)
    w2b = w2.astype(jnp.bfloat16).astype(jnp.float32)
    hp = jax.lax.Precision.HIGHEST
    h_ref = jnp.maximum(jnp.dot(xb, w1b, precision=hp) + b1, 0.0)
    h_ref = h_ref.astype(jnp.bfloat16).astype(jnp.float32)
    ref = (jnp.dot(h_ref, w2b, precision=hp) + b2).reshape(B, T, n_embd)

    assert out.shape == (B, T, n_embd)
    assert out.dtype == x.dtype
    assert jnp.allclose(out, ref, atol=5e-3, rtol=5e-3)

    print("KERNEL_OK")
</pallas_src>

<mosaic_0001>
module attributes {stable_mosaic.version = 11 : i64} {
  func.func @ffn_kernel_acc_out(%arg0: i32, %arg1: i32, %arg2: memref<16x128xf32, #tpu.memory_space<vmem>>, %arg3: memref<128x128xbf16, #tpu.memory_space<vmem>>, %arg4: memref<1x128xf32, #tpu.memory_space<vmem>>, %arg5: memref<128x128xbf16, #tpu.memory_space<vmem>>, %arg6: memref<1x128xf32, #tpu.memory_space<vmem>>, %arg7: memref<16x128xf32, #tpu.memory_space<vmem>>) attributes {dimension_semantics = [#tpu.dimension_semantics<parallel>, #tpu.dimension_semantics<arbitrary>], iteration_bounds = array<i64: 1, 1>, scalar_prefetch = 0 : i64, scratch_operands = 0 : i64, tpu.core_type = #tpu.core_type<tc>, window_params = [{transform_indices = @transform_0, window_bounds = array<i64: 16, 128>}, {transform_indices = @transform_1, window_bounds = array<i64: 128, 128>}, {transform_indices = @transform_2, window_bounds = array<i64: 1, 128>}, {transform_indices = @transform_3, window_bounds = array<i64: 128, 128>}, {pipeline_mode = #tpu.pipeline_mode<synchronous>, transform_indices = @transform_4, window_bounds = array<i64: 1, 128>}, {transform_indices = @transform_5, window_bounds = array<i64: 16, 128>}]} {
    %c0_i32 = arith.constant 0 : i32
    %0 = arith.cmpi eq, %arg1, %c0_i32 : i32
    %1 = arith.extui %0 : i1 to i32
    %c0_i32_0 = arith.constant 0 : i32
    %2 = arith.cmpi ne, %1, %c0_i32_0 : i32
    scf.if %2 {
      %c0_14 = arith.constant 0 : index
      %c0_15 = arith.constant 0 : index
      %18 = vector.load %arg6[%c0_14, %c0_15] : memref<1x128xf32, #tpu.memory_space<vmem>>, vector<1x128xf32>
      %19 = vector.shape_cast %18 : vector<1x128xf32> to vector<1x128xf32>
      %20 = vector.broadcast %19 : vector<1x128xf32> to vector<16x128xf32>
      %c0_16 = arith.constant 0 : index
      %c0_17 = arith.constant 0 : index
      %21 = vector.load %arg7[%c0_16, %c0_17] : memref<16x128xf32, #tpu.memory_space<vmem>>, vector<16x128xf32>
      tpu.vector_store %arg7[%c0_16, %c0_17], %20 {strides = array<i32>} : memref<16x128xf32, #tpu.memory_space<vmem>>, vector<16x128xf32>,
    } else {
    }
    %c0 = arith.constant 0 : index
    %c0_1 = arith.constant 0 : index
    %3 = vector.load %arg2[%c0, %c0_1] : memref<16x128xf32, #tpu.memory_space<vmem>>, vector<16x128xf32>
    %4 = arith.truncf %3 : vector<16x128xf32> to vector<16x128xbf16>
    %c0_2 = arith.constant 0 : index
    %c0_3 = arith.constant 0 : index
    %5 = vector.load %arg3[%c0_2, %c0_3] : memref<128x128xbf16, #tpu.memory_space<vmem>>, vector<128x128xbf16>
    %cst = arith.constant dense<0.000000e+00> : vector<16x128xf32>
    %6 = tpu.matmul %4, %5, %cst {dimension_numbers = #tpu.dot_dimension_numbers<[1], [0], [0], [1], [0, 0, 1, 1], [], []>} : vector<16x128xbf16>, vector<128x128xbf16>, vector<16x128xf32> -> vector<16x128xf32>
    %c0_4 = arith.constant 0 : index
    %c0_5 = arith.constant 0 : index
    %7 = vector.load %arg4[%c0_4, %c0_5] : memref<1x128xf32, #tpu.memory_space<vmem>>, vector<1x128xf32>
    %8 = vector.broadcast %7 : vector<1x128xf32> to vector<16x128xf32>
    %9 = arith.addf %6, %8 : vector<16x128xf32>
    %cst_6 = arith.constant 0.000000e+00 : f32
    %10 = vector.broadcast %cst_6 : f32 to vector<16x128xf32>
    %11 = arith.maximumf %9, %10 : vector<16x128xf32>
    %c0_7 = arith.constant 0 : index
    %c0_8 = arith.constant 0 : index
    %12 = vector.load %arg7[%c0_7, %c0_8] : memref<16x128xf32, #tpu.memory_space<vmem>>, vector<16x128xf32>
    %13 = arith.truncf %11 : vector<16x128xf32> to vector<16x128xbf16>
    %c0_9 = arith.constant 0 : index
    %c0_10 = arith.constant 0 : index
    %14 = vector.load %arg5[%c0_9, %c0_10] : memref<128x128xbf16, #tpu.memory_space<vmem>>, vector<128x128xbf16>
    %cst_11 = arith.constant dense<0.000000e+00> : vector<16x128xf32>
    %15 = tpu.matmul %13, %14, %cst_11 {dimension_numbers = #tpu.dot_dimension_numbers<[1], [0], [0], [1], [0, 0, 1, 1], [], []>} : vector<16x128xbf16>, vector<128x128xbf16>, vector<16x128xf32> -> vector<16x128xf32>
    %16 = arith.addf %12, %15 : vector<16x128xf32>
    %c0_12 = arith.constant 0 : index
    %c0_13 = arith.constant 0 : index
    %17 = vector.load %arg7[%c0_12, %c0_13] : memref<16x128xf32, #tpu.memory_space<vmem>>, vector<16x128xf32>
    tpu.vector_store %arg7[%c0_12, %c0_13], %16 {strides = array<i32>} : memref<16x128xf32, #tpu.memory_space<vmem>>, vector<16x128xf32>,
    return
  }
  func.func @transform_0(%arg0: i32, %arg1: i32) -> (i32, i32) {
    %c0_i32 = arith.constant 0 : i32
    %c0_i32_0 = arith.constant 0 : i32
    return %arg0, %c0_i32 : i32, i32
  }
  func.func @transform_1(%arg0: i32, %arg1: i32) -> (i32, i32) {
    %c0_i32 = arith.constant 0 : i32
    %c0_i32_0 = arith.constant 0 : i32
    return %c0_i32, %arg1 : i32, i32
  }
  func.func @transform_2(%arg0: i32, %arg1: i32) -> (i32, i32) {
    %c0_i32 = arith.constant 0 : i32
    %c0_i32_0 = arith.constant 0 : i32
    return %c0_i32, %arg1 : i32, i32
  }
  func.func @transform_3(%arg0: i32, %arg1: i32) -> (i32, i32) {
    %c0_i32 = arith.constant 0 : i32
    %c0_i32_0 = arith.constant 0 : i32
    return %arg1, %c0_i32 : i32, i32
  }
  func.func @transform_4(%arg0: i32, %arg1: i32) -> (i32, i32) {
    %c0_i32 = arith.constant 0 : i32
    %c0_i32_0 = arith.constant 0 : i32
    %c0_i32_1 = arith.constant 0 : i32
    return %c0_i32, %c0_i32_0 : i32, i32
  }
  func.func @transform_5(%arg0: i32, %arg1: i32) -> (i32, i32) {
    %c0_i32 = arith.constant 0 : i32
    %c0_i32_0 = arith.constant 0 : i32
    return %arg0, %c0_i32 : i32, i32
  }
}

</mosaic_0001>

<bundles_post_ra>
// kernel: _ffn_padded.1
= control target key start
LH: loop header
LB: loop body
LE: loop exit
PB: predicated region body
PF: predicated region fallthrough
CT: control target
= control target key end

     0   :  { %10 = vsyncpa [#allocation3], 0  ;;  %s521_s0 = inlined_call_operand.vmem [shape: f32[16,128], index: 0, kind: input, shape index: {}]   ;;  %s522_s1 = inlined_call_operand.hbm [shape: bf16[128,128], index: 1, kind: input, shape index: {}]   ;;  %s523_s2 = inlined_call_operand.vmem [shape: f32[1,128], index: 2, kind: input, shape index: {}]   ;;  %s524_s3 = inlined_call_operand.hbm [shape: bf16[128,128], index: 3, kind: input, shape index: {}]   ;;  %s525_s4 = inlined_call_operand.vmem [shape: f32[1,128], index: 4, kind: input, shape index: {}]   ;;  %s526_s5 = inlined_call_operand.vmem [shape: f32[16,128], index: 5, kind: output, shape index: {}]  }
   0x1   :  { %11 = vsyncpa [#allocation5], 0  ;;  %s443_s18 = smov [#allocation2]   ;;  %s395_s22 = scalar_lea.hbm %s522_s1, 1024 }
   0x2   :  { %s19_s19 = sshll.u32 %s443_s18, 4  ;;  %p396_p0 = scmp.ne.s32.totalorder %s522_s1, %s395_s22  ;;  %s20_s19 = int_to_ptr.vmem [resolvable:$true] %s19_s19 }
   0x3   :  { %p399_p1 = scmp.lt.u32.totalorder %s395_s22, %s522_s1 }
   0x5   :  { %p401_p2 = pnand %p399_p1, %p396_p0 }
   0x7   :  { %404 = shalt.err (!%p401_p2)
}
   0x8   :  { %s405_s27 = scalar_lea.vmem %s20_s19, 1024  ;;  %p410_p4 = scmp.lt.s32.totalorder %s20_s19, %s20_s19 }
   0x9   :  { %p406_p3 = scmp.ne.s32.totalorder %s20_s19, %s405_s27  ;;  %p411_p5 = scmp.lt.s32.totalorder %s405_s27, %s405_s27 }
   0xb   :  { %p412_p6 = por %p411_p5, %p410_p4 }
   0xd   :  { %p413_p7 = pnand %p412_p6, %p406_p3 }
   0xf   :  { %416 = shalt.err (!%p413_p7)
}
  0x10   :  { %s444_s28 = smov 64   ;;  %s445_s29 = smov 4  }
  0x11   :  { %25 = dma.hbm_to_vmem [thread:$0]  %s522_s1, 1024, %s20_s19, [#allocation3], %s444_s28, %s444_s28, %s445_s29  }
  0x12   :  { %s446_s7 = smov [#allocation4]   ;;  %s417_s11 = scalar_lea.hbm %s524_s3, 1024 }
  0x13   :  { %s33_s8 = sshll.u32 %s446_s7, 4  ;;  %p418_p8 = scmp.ne.s32.totalorder %s524_s3, %s417_s11  ;;  %s34_s8 = int_to_ptr.vmem [resolvable:$true] %s33_s8 }
  0x14   :  { %p421_p9 = scmp.lt.u32.totalorder %s417_s11, %s524_s3 }
  0x16   :  { %p423_p10 = pnand %p421_p9, %p418_p8 }
  0x18   :  { %426 = shalt.err (!%p423_p10)
}
  0x19   :  { %s427_s16 = scalar_lea.vmem %s34_s8, 1024  ;;  %p432_p12 = scmp.lt.s32.totalorder %s34_s8, %s34_s8 }
  0x1a   :  { %p428_p11 = scmp.ne.s32.totalorder %s34_s8, %s427_s16  ;;  %p433_p13 = scmp.lt.s32.totalorder %s427_s16, %s427_s16 }
  0x1c   :  { %p434_p0 = por %p433_p13, %p432_p12 }
  0x1e   :  { %p435_p1 = pnand %p434_p0, %p428_p11 }
  0x20   :  { %438 = shalt.err (!%p435_p1)
}
  0x21   :  { %39 = dma.hbm_to_vmem [thread:$0]  %s524_s3, 1024, %s34_s8, [#allocation5], %s444_s28, %s444_s28, %s445_s29  }
  0x22   :  { %439 = dma.done.wait [#allocation3], 1024  }
  0x23   :  { %440 = vsyncadd [#allocation3], 4294966272 }
  0x24   :  { %441 = dma.done.wait [#allocation5], 1024  }
  0x25   :  { %442 = vsyncadd [#allocation5], 4294966272  ;;  %v447_v0 = vmov 0.0   ;;  %vm448_vm0 = vmmov 0   ;;  %v379_v1 = vld [vmem:[#allocation2] sm:$0xff]   ;;  %v380_v2 = vld [vmem:[#allocation2 + $0x8] sm:$0xff]  }
  0x26   :  { %333 = vmatprep.subr.bf16.mxu0 %v447_v0  ;;  %349 = vmatprep.mubr.msk.bf16.mxu0 %vm448_vm0, %v447_v0  ;;  %v381_v3 = vld [vmem:[#allocation2 + $0x10] sm:$0xff]   ;;  %v387_v4 = vld [vmem:[#allocation4] sm:$0xff]   ;;  %v382_v5 = vld [vmem:[#allocation2 + $0x18] sm:$0xff]  }
  0x27   :  { %353 = vmatprep.subr.bf16.mxu1 %v447_v0  ;;  %369 = vmatprep.mubr.msk.bf16.mxu1 %vm448_vm0, %v447_v0  ;;  %v388_v6 = vld [vmem:[#allocation4 + $0x8] sm:$0xff]   ;;  %v383_v7 = vld [vmem:[#allocation2 + $0x20] sm:$0xff]   ;;  %v389_v8 = vld [vmem:[#allocation4 + $0x10] sm:$0xff]  }
  0x28   :  { %334 = vmatpush3.bf16.msra.mxu0 %v379_v1  ;;  %354 = vmatpush3.bf16.msra.mxu1 %v387_v4  ;;  %v384_v9 = vld [vmem:[#allocation2 + $0x28] sm:$0xff]   ;;  %v390_v10 = vld [vmem:[#allocation4 + $0x18] sm:$0xff]   ;;  %v385_v11 = vld [vmem:[#allocation2 + $0x30] sm:$0xff]  }
  0x29   :  { %335 = vmatprep.subr.bf16.mxu0 %v447_v0  ;;  %355 = vmatprep.subr.bf16.mxu1 %v447_v0  ;;  %v391_v12 = vld [vmem:[#allocation4 + $0x20] sm:$0xff]   ;;  %v386_v13 = vld [vmem:[#allocation2 + $0x38] sm:$0xff]   ;;  %v63_v15 = vld [vmem:[%s521_s0 + $0x8] sm:$0xff] }
  0x2a   :  { %v62_v14 = vld [vmem:[%s521_s0] sm:$0xff]  ;;  %v392_v16 = vld [vmem:[#allocation4 + $0x28] sm:$0xff]   ;;  %v393_v18 = vld [vmem:[#allocation4 + $0x30] sm:$0xff]  }
  0x2b   :  { %v64_v17 = vpack.c.bf16 %v63_v15, %v62_v14  ;;  %v394_v19 = vld [vmem:[#allocation4 + $0x38] sm:$0xff]   ;;  %v298_v20 = vld [vmem:[%s523_s2] ss:$0 sm:$0xff] }
  0x2c   :  { %336 = vmatpush3.bf16.msra.mxu0 %v380_v2  ;;  %356 = vmatpush3.bf16.msra.mxu1 %v388_v6  ;;  %v297_v30 = vld [vmem:[%s525_s4] ss:$0 sm:$0xff] }
  0x2d   :  { %337 = vmatprep.subr.bf16.mxu0 %v447_v0  ;;  %357 = vmatprep.subr.bf16.mxu1 %v447_v0 }
  0x30   :  { %338 = vmatpush3.bf16.msra.mxu0 %v381_v3  ;;  %358 = vmatpush3.bf16.msra.mxu1 %v389_v8 }
  0x31   :  { %339 = vmatprep.subr.bf16.mxu0 %v447_v0  ;;  %359 = vmatprep.subr.bf16.mxu1 %v447_v0 }
  0x34   :  { %340 = vmatpush3.bf16.msra.mxu0 %v382_v5  ;;  %360 = vmatpush3.bf16.msra.mxu1 %v390_v10 }
  0x35   :  { %341 = vmatprep.subr.bf16.mxu0 %v447_v0  ;;  %361 = vmatprep.subr.bf16.mxu1 %v447_v0 }
  0x38   :  { %342 = vmatpush3.bf16.msra.mxu0 %v383_v7  ;;  %362 = vmatpush3.bf16.msra.mxu1 %v391_v12 }
  0x39   :  { %343 = vmatprep.subr.bf16.mxu0 %v447_v0  ;;  %363 = vmatprep.subr.bf16.mxu1 %v447_v0 }
  0x3c   :  { %344 = vmatpush3.bf16.msra.mxu0 %v384_v9  ;;  %364 = vmatpush3.bf16.msra.mxu1 %v392_v16 }
  0x3d   :  { %345 = vmatprep.subr.bf16.mxu0 %v447_v0  ;;  %365 = vmatprep.subr.bf16.mxu1 %v447_v0 }
  0x40   :  { %346 = vmatpush3.bf16.msra.mxu0 %v385_v11  ;;  %366 = vmatpush3.bf16.msra.mxu1 %v393_v18 }
  0x41   :  { %347 = vmatprep.subr.bf16.mxu0 %v447_v0  ;;  %367 = vmatprep.subr.bf16.mxu1 %v447_v0 }
  0x44   :  { %348 = vmatpush3.bf16.msra.mxu0 %v386_v13  ;;  %368 = vmatpush3.bf16.msra.mxu1 %v394_v19 }
  0x47   :  { %350 = vmatmul.mubr.bf16.vlgmr.msra.gmra.mrb[0].mxu0 %v64_v17 }
 0x11a   :  { %v170_v21 = vpop.f32.mrb[0].mxu0 }
 0x11b   :  { %v171_v22 = vadd.f32 %v298_v20, %v170_v21  ;;  %v351_v23 = vpop.f32.mrb[1].mxu0 }
 0x11c   :  { %v173_v24 = vpop.f32.mrb[2].mxu0 }
 0x11d   :  { %v174_v25 = vadd.f32 %v298_v20, %v173_v24  ;;  %v352_v26 = vpop.f32.mrb[3].mxu0  ;;  %v177_v27 = vmax.f32 %v171_v22, 0.0 }
 0x11f   :  { %v178_v28 = vmax.f32 %v174_v25, 0.0 }
 0x121   :  { %v181_v29 = vpack.c.bf16 %v178_v28, %v177_v27 }
 0x123   :  { %370 = vmatmul.mubr.bf16.vlgmr.msra.gmra.mrb[0].mxu1 %v181_v29 }
 0x1f6   :  { %v280_v31 = vpop.f32.mrb[0].mxu1 }
 0x1f7   :  { %v287_v32 = vadd.f32 %v297_v30, %v280_v31  ;;  %v371_v33 = vpop.f32.mrb[1].mxu1 }
 0x1f8   :  { %v283_v34 = vpop.f32.mrb[2].mxu1 }
 0x1f9   :  { %289 = vst [vmem:[%s526_s5] sm:$0xff] %v287_v32  ;;  %v288_v35 = vadd.f32 %v297_v30, %v283_v34  ;;  %v372_v36 = vpop.f32.mrb[3].mxu1 }
 0x1fb   :  { %290 = vst [vmem:[%s526_s5 + $0x8] sm:$0xff] %v288_v35 }
 0x1fc   :  { %295 = vsyncpa [#allocation3], 1 }
 0x1fd   :  { %296 = vsyncpa [#allocation5], 1 }

</bundles_post_ra>
